<compile_context>
chip_gen: v6e
topology: v6e:2x2x1
jax: 0.10.0
libtpu: 0.0.40
codegen_flags: <defaults>
</compile_context>

<pallas_src>
import math
from functools import partial

import jax
import jax.numpy as jnp
from jax.experimental import pallas as pl
from jax.experimental.pallas import tpu as pltpu


# ----------------------------- Pallas kernel --------------------------------
def _ffn_layer_kernel(x_ref, w1_ref, b1_ref, w2_ref, b2_ref,
                      gamma_ref, beta_ref, out_ref, *, eps):
    """One row-tile per grid step.

    x_ref / out_ref : (TM, E) f32 VMEM blocks
    w1_ref : (E, F) bf16 (pre-transposed:  h = x @ w1 + b1)
    b1_ref : (1, F) f32
    w2_ref : (F, E) bf16 (pre-transposed:  t2 = h @ w2 + b2)
    b2_ref : (1, E) f32
    gamma_ref / beta_ref : (1, E) f32
    """
    x = x_ref[...]                                            # (TM, E) f32

    # linear1 + ReLU: bf16 MXU inputs, f32 accumulation, bias/ReLU in f32.
    h = jnp.dot(x.astype(jnp.bfloat16), w1_ref[...],
                preferred_element_type=jnp.float32)
    h = jnp.maximum(h + b1_ref[...], 0.0)

    # linear2: feed the ReLU output to the MXU in bf16 (halves the (TM, F)
    # intermediate and runs the MXU at native bf16 rate), accumulate in f32.
    tgt2 = jnp.dot(h.astype(jnp.bfloat16), w2_ref[...],
                   preferred_element_type=jnp.float32) + b2_ref[...]

    # residual + LayerNorm (biased variance, matching nn.LayerNorm) — all f32.
    y = x + tgt2
    mean = jnp.mean(y, axis=-1, keepdims=True)
    yc = y - mean
    var = jnp.mean(yc * yc, axis=-1, keepdims=True)
    inv = jax.lax.rsqrt(var + eps)
    out_ref[...] = yc * inv * gamma_ref[...] + beta_ref[...]


# ------------------------------- Wrapper -------------------------------------
def _round_up(x, m):
    return ((x + m - 1) // m) * m


def _ffn_pallas_call(x, w1t, b1, w2t, b2, gamma, beta, *,
                     TM, n_tiles, Mpad, eps, single_buffer_weights):
    E = x.shape[1]
    Fh = w1t.shape[1]

    def resident(shape):
        # Constant index_map: block is revisited every grid step.  Request a
        # single buffer so it isn't double-buffered (pure VMEM savings).
        if single_buffer_weights:
            return pl.BlockSpec(shape, lambda i: (0,) * len(shape),
                                pipeline_mode=pl.Buffered(1))
        return pl.BlockSpec(shape, lambda i: (0,) * len(shape))

    bytes_accessed = (
        Mpad * E * 4 * 2              # x in + out (f32)
        + 2 * E * Fh * 2              # w1 + w2 (bf16)
        + (Fh + 3 * E) * 4            # biases + LayerNorm params (f32)
    )
    cost = pl.CostEstimate(flops=4 * Mpad * E * Fh,
                           transcendentals=Mpad,
                           bytes_accessed=bytes_accessed)

    return pl.pallas_call(
        partial(_ffn_layer_kernel, eps=eps),
        out_shape=jax.ShapeDtypeStruct((Mpad, E), jnp.float32),
        grid_spec=pltpu.PrefetchScalarGridSpec(
            num_scalar_prefetch=0,
            grid=(n_tiles,),
            in_specs=[
                pl.BlockSpec((TM, E), lambda i: (i, 0)),   # x row tile (pipelined)
                resident((E, Fh)),                         # w1 (bf16, resident)
                resident((1, Fh)),                         # b1
                resident((Fh, E)),                         # w2 (bf16, resident)
                resident((1, E)),                          # b2
                resident((1, E)),                          # ln gamma
                resident((1, E)),                          # ln beta
            ],
            out_specs=pl.BlockSpec((TM, E), lambda i: (i, 0)),
        ),
        compiler_params=pltpu.CompilerParams(
            dimension_semantics=("parallel",),
            vmem_limit_bytes=64 * 1024 * 1024),
        cost_estimate=cost,
    )(x, w1t, b1, w2t, b2, gamma, beta)


def ffn_layer(tgt, params, *, eps=1e-5, max_rows_per_block=1024):
    """tgt: (L, N, E) float32. Returns (L, N, E).

    FFN + LayerNorm are purely row-wise, so (L, N, E) is flattened to (L*N, E)
    and tiled over rows only (one big MXU-friendly M dimension).
    """
    L, N, E = tgt.shape
    Fh = params["w1"].shape[0]          # dim_feedforward (PyTorch w1 is (F, E))

    M = L * N
    x = tgt.reshape(M, E)

    # Row tile: when there is enough work, force >= 2 tiles (multiples of 256)
    # so the "parallel" grid axis can shard across v7x's two TensorCores; the
    # extra grid step is harmless on 1-TC v5e/v6e.
    _SPLIT_MIN = 256
    if M >= 2 * _SPLIT_MIN:
        TM = min(max_rows_per_block, _round_up(pl.cdiv(M, 2), 256))
    else:
        TM = min(max_rows_per_block, _round_up(M, 8))
    n_tiles = pl.cdiv(M, TM)
    Mpad = n_tiles * TM
    if Mpad != M:
        x = jnp.pad(x, ((0, Mpad - M), (0, 0)))

    # Wrapper-side weight prep (trace-time only): transpose so the kernel does
    # `x @ W` directly, and cast weights to bf16 (halves DMA bytes + VMEM).
    w1t = jnp.transpose(params["w1"]).astype(jnp.bfloat16)      # (E, F)
    b1 = params["b1"].reshape(1, Fh).astype(jnp.float32)
    w2t = jnp.transpose(params["w2"]).astype(jnp.bfloat16)      # (F, E)
    b2 = params["b2"].reshape(1, E).astype(jnp.float32)
    gamma = params["ln_weight"].reshape(1, E).astype(jnp.float32)
    beta = params["ln_bias"].reshape(1, E).astype(jnp.float32)

    try:
        out = _ffn_pallas_call(x, w1t, b1, w2t, b2, gamma, beta,
                               TM=TM, n_tiles=n_tiles, Mpad=Mpad, eps=eps,
                               single_buffer_weights=True)
    except Exception:
        # Fallback for JAX builds that reject pipeline_mode=pl.Buffered(1):
        # identical semantics, just default (double) buffering of the weights.
        out = _ffn_pallas_call(x, w1t, b1, w2t, b2, gamma, beta,
                               TM=TM, n_tiles=n_tiles, Mpad=Mpad, eps=eps,
                               single_buffer_weights=False)

    return out[:M].reshape(L, N, E)


# -------------------------- Parameter initialization -------------------------
def init_params(key, d_model, dim_feedforward):
    """xavier_uniform for dim>1 params (matching _reset_parameters); PyTorch
    Linear-default uniform for biases; LayerNorm ones/zeros."""
    k1, k2, k3, k4 = jax.random.split(key, 4)

    def xavier(k, shape):
        fan_out, fan_in = shape
        limit = math.sqrt(6.0 / (fan_in + fan_out))
        return jax.random.uniform(k, shape, jnp.float32, -limit, limit)

    def linear_bias(k, fan_in, n):
        bound = 1.0 / math.sqrt(fan_in)
        return jax.random.uniform(k, (n,), jnp.float32, -bound, bound)

    return {
        "w1": xavier(k1, (dim_feedforward, d_model)),      # (F, E) PyTorch layout
        "b1": linear_bias(k2, d_model, dim_feedforward),
        "w2": xavier(k3, (d_model, dim_feedforward)),      # (E, F) PyTorch layout
        "b2": linear_bias(k4, dim_feedforward, d_model),
        "ln_weight": jnp.ones((d_model,), jnp.float32),
        "ln_bias": jnp.zeros((d_model,), jnp.float32),
    }


# ---------------------------- Pure-JAX reference ------------------------------
def reference(tgt, params, *, eps=1e-5):
    h = jnp.maximum(tgt @ params["w1"].T + params["b1"], 0.0)
    tgt2 = h @ params["w2"].T + params["b2"]
    y = tgt + tgt2
    mean = jnp.mean(y, -1, keepdims=True)
    var = jnp.mean((y - mean) ** 2, -1, keepdims=True)
    return (y - mean) * jax.lax.rsqrt(var + eps) * params["ln_weight"] + params["ln_bias"]


# ------------------------------------ Main ------------------------------------
if __name__ == "__main__":
    # Small test config.  NOTE: benchmark / tune at real Mask2Former widths
    # (E=256, F=2048, M in the thousands); these toy shapes are overhead-bound.
    L, N, E, F = 8, 2, 32, 128        # seq=8, batch=2, d_model=32, dim_feedforward=128

    key = jax.random.PRNGKey(0)
    kp, kt = jax.random.split(key, 2)
    params = init_params(kp, E, F)
    tgt = jax.random.normal(kt, (L, N, E), jnp.float32)

    out = ffn_layer(tgt, params)
    out = jax.block_until_ready(out)

    ref = reference(tgt, params)
    assert out.shape == (L, N, E)
    # Tolerance loosened vs. the f32 reference: matmul inputs are bf16
    # (f32 accumulation); residual + LayerNorm are exact f32.
    assert jnp.allclose(out, ref, atol=5e-2, rtol=5e-2), "mismatch vs reference"

    print("KERNEL_OK")
</pallas_src>

<mosaic_0001>
module attributes {stable_mosaic.version = 11 : i64} {
  func.func @_ffn_layer_kernel(%arg0: i32, %arg1: memref<16x32xf32, #tpu.memory_space<vmem>>, %arg2: memref<32x128xbf16, #tpu.memory_space<vmem>>, %arg3: memref<1x128xf32, #tpu.memory_space<vmem>>, %arg4: memref<128x32xbf16, #tpu.memory_space<vmem>>, %arg5: memref<1x32xf32, #tpu.memory_space<vmem>>, %arg6: memref<1x32xf32, #tpu.memory_space<vmem>>, %arg7: memref<1x32xf32, #tpu.memory_space<vmem>>, %arg8: memref<16x32xf32, #tpu.memory_space<vmem>>) attributes {dimension_semantics = [#tpu.dimension_semantics<parallel>], iteration_bounds = array<i64: 1>, scalar_prefetch = 0 : i64, scratch_operands = 0 : i64, tpu.core_type = #tpu.core_type<tc>, window_params = [{transform_indices = @transform_0, window_bounds = array<i64: 16, 32>}, {pipeline_mode = #tpu.pipeline_mode<synchronous>, transform_indices = @transform_1, window_bounds = array<i64: 32, 128>}, {pipeline_mode = #tpu.pipeline_mode<synchronous>, transform_indices = @transform_2, window_bounds = array<i64: 1, 128>}, {pipeline_mode = #tpu.pipeline_mode<synchronous>, transform_indices = @transform_3, window_bounds = array<i64: 128, 32>}, {pipeline_mode = #tpu.pipeline_mode<synchronous>, transform_indices = @transform_4, window_bounds = array<i64: 1, 32>}, {pipeline_mode = #tpu.pipeline_mode<synchronous>, transform_indices = @transform_5, window_bounds = array<i64: 1, 32>}, {pipeline_mode = #tpu.pipeline_mode<synchronous>, transform_indices = @transform_6, window_bounds = array<i64: 1, 32>}, {transform_indices = @transform_7, window_bounds = array<i64: 16, 32>}]} {
    %c0 = arith.constant 0 : index
    %c0_0 = arith.constant 0 : index
    %0 = vector.load %arg1[%c0, %c0_0] : memref<16x32xf32, #tpu.memory_space<vmem>>, vector<16x32xf32>
    %1 = arith.truncf %0 : vector<16x32xf32> to vector<16x32xbf16>
    %c0_1 = arith.constant 0 : index
    %c0_2 = arith.constant 0 : index
    %2 = vector.load %arg2[%c0_1, %c0_2] : memref<32x128xbf16, #tpu.memory_space<vmem>>, vector<32x128xbf16>
    %cst = arith.constant dense<0.000000e+00> : vector<16x128xf32>
    %3 = tpu.matmul %1, %2, %cst {dimension_numbers = #tpu.dot_dimension_numbers<[1], [0], [0], [1], [0, 0, 1, 1], [], []>} : vector<16x32xbf16>, vector<32x128xbf16>, vector<16x128xf32> -> vector<16x128xf32>
    %c0_3 = arith.constant 0 : index
    %c0_4 = arith.constant 0 : index
    %4 = vector.load %arg3[%c0_3, %c0_4] : memref<1x128xf32, #tpu.memory_space<vmem>>, vector<1x128xf32>
    %5 = vector.broadcast %4 : vector<1x128xf32> to vector<16x128xf32>
    %6 = arith.addf %3, %5 : vector<16x128xf32>
    %cst_5 = arith.constant 0.000000e+00 : f32
    %7 = vector.broadcast %cst_5 : f32 to vector<16x128xf32>
    %8 = arith.maximumf %6, %7 : vector<16x128xf32>
    %9 = arith.truncf %8 : vector<16x128xf32> to vector<16x128xbf16>
    %c0_6 = arith.constant 0 : index
    %c0_7 = arith.constant 0 : index
    %10 = vector.load %arg4[%c0_6, %c0_7] : memref<128x32xbf16, #tpu.memory_space<vmem>>, vector<128x32xbf16>
    %cst_8 = arith.constant dense<0.000000e+00> : vector<16x32xf32>
    %11 = tpu.matmul %9, %10, %cst_8 {dimension_numbers = #tpu.dot_dimension_numbers<[1], [0], [0], [1], [0, 0, 1, 1], [], []>} : vector<16x128xbf16>, vector<128x32xbf16>, vector<16x32xf32> -> vector<16x32xf32>
    %c0_9 = arith.constant 0 : index
    %c0_10 = arith.constant 0 : index
    %12 = vector.load %arg5[%c0_9, %c0_10] : memref<1x32xf32, #tpu.memory_space<vmem>>, vector<1x32xf32>
    %13 = vector.broadcast %12 : vector<1x32xf32> to vector<16x32xf32>
    %14 = arith.addf %11, %13 : vector<16x32xf32>
    %15 = arith.addf %0, %14 : vector<16x32xf32>
    %cst_11 = arith.constant dense<0.000000e+00> : vector<16xf32>
    %16 = vector.multi_reduction <add>, %15, %cst_11 [1] : vector<16x32xf32> to vector<16xf32>
    %17 = vector.shape_cast %16 : vector<16xf32> to vector<16x1xf32>
    %cst_12 = arith.constant 3.200000e+01 : f32
    %18 = vector.broadcast %cst_12 : f32 to vector<16x1xf32>
    %19 = arith.divf %17, %18 : vector<16x1xf32>
    %20 = vector.broadcast %19 : vector<16x1xf32> to vector<16x32xf32>
    %21 = arith.subf %15, %20 : vector<16x32xf32>
    %22 = arith.mulf %21, %21 : vector<16x32xf32>
    %cst_13 = arith.constant dense<0.000000e+00> : vector<16xf32>
    %23 = vector.multi_reduction <add>, %22, %cst_13 [1] : vector<16x32xf32> to vector<16xf32>
    %24 = vector.shape_cast %23 : vector<16xf32> to vector<16x1xf32>
    %cst_14 = arith.constant 3.200000e+01 : f32
    %25 = vector.broadcast %cst_14 : f32 to vector<16x1xf32>
    %26 = arith.divf %24, %25 : vector<16x1xf32>
    %cst_15 = arith.constant 9.99999974E-6 : f32
    %27 = vector.broadcast %cst_15 : f32 to vector<16x1xf32>
    %28 = arith.addf %26, %27 : vector<16x1xf32>
    %29 = math.rsqrt %28 : vector<16x1xf32>
    %30 = vector.broadcast %29 : vector<16x1xf32> to vector<16x32xf32>
    %31 = arith.mulf %21, %30 : vector<16x32xf32>
    %c0_16 = arith.constant 0 : index
    %c0_17 = arith.constant 0 : index
    %32 = vector.load %arg6[%c0_16, %c0_17] : memref<1x32xf32, #tpu.memory_space<vmem>>, vector<1x32xf32>
    %33 = vector.broadcast %32 : vector<1x32xf32> to vector<16x32xf32>
    %34 = arith.mulf %31, %33 : vector<16x32xf32>
    %c0_18 = arith.constant 0 : index
    %c0_19 = arith.constant 0 : index
    %35 = vector.load %arg7[%c0_18, %c0_19] : memref<1x32xf32, #tpu.memory_space<vmem>>, vector<1x32xf32>
    %36 = vector.broadcast %35 : vector<1x32xf32> to vector<16x32xf32>
    %37 = arith.addf %34, %36 : vector<16x32xf32>
    %c0_20 = arith.constant 0 : index
    %c0_21 = arith.constant 0 : index
    %38 = vector.load %arg8[%c0_20, %c0_21] : memref<16x32xf32, #tpu.memory_space<vmem>>, vector<16x32xf32>
    tpu.vector_store %arg8[%c0_20, %c0_21], %37 {strides = array<i32>} : memref<16x32xf32, #tpu.memory_space<vmem>>, vector<16x32xf32>,
    return
  }
  func.func @transform_0(%arg0: i32) -> (i32, i32) {
    %c0_i32 = arith.constant 0 : i32
    %c0_i32_0 = arith.constant 0 : i32
    return %arg0, %c0_i32 : i32, i32
  }
  func.func @transform_1(%arg0: i32) -> (i32, i32) {
    %c0_i32 = arith.constant 0 : i32
    %c0_i32_0 = arith.constant 0 : i32
    %c0_i32_1 = arith.constant 0 : i32
    return %c0_i32, %c0_i32_0 : i32, i32
  }
  func.func @transform_2(%arg0: i32) -> (i32, i32) {
    %c0_i32 = arith.constant 0 : i32
    %c0_i32_0 = arith.constant 0 : i32
    %c0_i32_1 = arith.constant 0 : i32
    return %c0_i32, %c0_i32_0 : i32, i32
  }
  func.func @transform_3(%arg0: i32) -> (i32, i32) {
    %c0_i32 = arith.constant 0 : i32
    %c0_i32_0 = arith.constant 0 : i32
    %c0_i32_1 = arith.constant 0 : i32
    return %c0_i32, %c0_i32_0 : i32, i32
  }
  func.func @transform_4(%arg0: i32) -> (i32, i32) {
    %c0_i32 = arith.constant 0 : i32
    %c0_i32_0 = arith.constant 0 : i32
    %c0_i32_1 = arith.constant 0 : i32
    return %c0_i32, %c0_i32_0 : i32, i32
  }
  func.func @transform_5(%arg0: i32) -> (i32, i32) {
    %c0_i32 = arith.constant 0 : i32
    %c0_i32_0 = arith.constant 0 : i32
    %c0_i32_1 = arith.constant 0 : i32
    return %c0_i32, %c0_i32_0 : i32, i32
  }
  func.func @transform_6(%arg0: i32) -> (i32, i32) {
    %c0_i32 = arith.constant 0 : i32
    %c0_i32_0 = arith.constant 0 : i32
    %c0_i32_1 = arith.constant 0 : i32
    return %c0_i32, %c0_i32_0 : i32, i32
  }
  func.func @transform_7(%arg0: i32) -> (i32, i32) {
    %c0_i32 = arith.constant 0 : i32
    %c0_i32_0 = arith.constant 0 : i32
    return %arg0, %c0_i32 : i32, i32
  }
}

module attributes {stable_mosaic.version = 11 : i64} {
  func.func @_ffn_layer_kernel(%arg0: i32, %arg1: memref<16x32xf32, #tpu.memory_space<vmem>>, %arg2: memref<32x128xbf16, #tpu.memory_space<vmem>>, %arg3: memref<1x128xf32, #tpu.memory_space<vmem>>, %arg4: memref<128x32xbf16, #tpu.memory_space<vmem>>, %arg5: memref<1x32xf32, #tpu.memory_space<vmem>>, %arg6: memref<1x32xf32, #tpu.memory_space<vmem>>, %arg7: memref<1x32xf32, #tpu.memory_space<vmem>>, %arg8: memref<16x32xf32, #tpu.memory_space<vmem>>) attributes {dimension_semantics = [#tpu.dimension_semantics<parallel>], iteration_bounds = array<i64: 1>, scalar_prefetch = 0 : i64, scratch_operands = 0 : i64, tpu.core_type = #tpu.core_type<tc>, window_params = [{transform_indices = @transform_0, window_bounds = array<i64: 16, 32>}, {pipeline_mode = #tpu.pipeline_mode<synchronous>, transform_indices = @transform_1, window_bounds = array<i64: 32, 128>}, {pipeline_mode = #tpu.pipeline_mode<synchronous>, transform_indices = @transform_2, window_bounds = array<i64: 1, 128>}, {pipeline_mode = #tpu.pipeline_mode<synchronous>, transform_indices = @transform_3, window_bounds = array<i64: 128, 32>}, {pipeline_mode = #tpu.pipeline_mode<synchronous>, transform_indices = @transform_4, window_bounds = array<i64: 1, 32>}, {pipeline_mode = #tpu.pipeline_mode<synchronous>, transform_indices = @transform_5, window_bounds = array<i64: 1, 32>}, {pipeline_mode = #tpu.pipeline_mode<synchronous>, transform_indices = @transform_6, window_bounds = array<i64: 1, 32>}, {transform_indices = @transform_7, window_bounds = array<i64: 16, 32>}]} {
    %c0 = arith.constant 0 : index
    %c0_0 = arith.constant 0 : index
    %0 = vector.load %arg1[%c0, %c0_0] : memref<16x32xf32, #tpu.memory_space<vmem>>, vector<16x32xf32>
    %1 = arith.truncf %0 : vector<16x32xf32> to vector<16x32xbf16>
    %c0_1 = arith.constant 0 : index
    %c0_2 = arith.constant 0 : index
    %2 = vector.load %arg2[%c0_1, %c0_2] : memref<32x128xbf16, #tpu.memory_space<vmem>>, vector<32x128xbf16>
    %cst = arith.constant dense<0.000000e+00> : vector<16x128xf32>
    %3 = tpu.matmul %1, %2, %cst {dimension_numbers = #tpu.dot_dimension_numbers<[1], [0], [0], [1], [0, 0, 1, 1], [], []>} : vector<16x32xbf16>, vector<32x128xbf16>, vector<16x128xf32> -> vector<16x128xf32>
    %c0_3 = arith.constant 0 : index
    %c0_4 = arith.constant 0 : index
    %4 = vector.load %arg3[%c0_3, %c0_4] : memref<1x128xf32, #tpu.memory_space<vmem>>, vector<1x128xf32>
    %5 = vector.broadcast %4 : vector<1x128xf32> to vector<16x128xf32>
    %6 = arith.addf %3, %5 : vector<16x128xf32>
    %cst_5 = arith.constant 0.000000e+00 : f32
    %7 = vector.broadcast %cst_5 : f32 to vector<16x128xf32>
    %8 = arith.maximumf %6, %7 : vector<16x128xf32>
    %9 = arith.truncf %8 : vector<16x128xf32> to vector<16x128xbf16>
    %c0_6 = arith.constant 0 : index
    %c0_7 = arith.constant 0 : index
    %10 = vector.load %arg4[%c0_6, %c0_7] : memref<128x32xbf16, #tpu.memory_space<vmem>>, vector<128x32xbf16>
    %cst_8 = arith.constant dense<0.000000e+00> : vector<16x32xf32>
    %11 = tpu.matmul %9, %10, %cst_8 {dimension_numbers = #tpu.dot_dimension_numbers<[1], [0], [0], [1], [0, 0, 1, 1], [], []>} : vector<16x128xbf16>, vector<128x32xbf16>, vector<16x32xf32> -> vector<16x32xf32>
    %c0_9 = arith.constant 0 : index
    %c0_10 = arith.constant 0 : index
    %12 = vector.load %arg5[%c0_9, %c0_10] : memref<1x32xf32, #tpu.memory_space<vmem>>, vector<1x32xf32>
    %13 = vector.broadcast %12 : vector<1x32xf32> to vector<16x32xf32>
    %14 = arith.addf %11, %13 : vector<16x32xf32>
    %15 = arith.addf %0, %14 : vector<16x32xf32>
    %cst_11 = arith.constant dense<0.000000e+00> : vector<16xf32>
    %16 = vector.multi_reduction <add>, %15, %cst_11 [1] : vector<16x32xf32> to vector<16xf32>
    %17 = vector.shape_cast %16 : vector<16xf32> to vector<16x1xf32>
    %cst_12 = arith.constant 3.200000e+01 : f32
    %18 = vector.broadcast %cst_12 : f32 to vector<16x1xf32>
    %19 = arith.divf %17, %18 : vector<16x1xf32>
    %20 = vector.broadcast %19 : vector<16x1xf32> to vector<16x32xf32>
    %21 = arith.subf %15, %20 : vector<16x32xf32>
    %22 = arith.mulf %21, %21 : vector<16x32xf32>
    %cst_13 = arith.constant dense<0.000000e+00> : vector<16xf32>
    %23 = vector.multi_reduction <add>, %22, %cst_13 [1] : vector<16x32xf32> to vector<16xf32>
    %24 = vector.shape_cast %23 : vector<16xf32> to vector<16x1xf32>
    %cst_14 = arith.constant 3.200000e+01 : f32
    %25 = vector.broadcast %cst_14 : f32 to vector<16x1xf32>
    %26 = arith.divf %24, %25 : vector<16x1xf32>
    %cst_15 = arith.constant 9.99999974E-6 : f32
    %27 = vector.broadcast %cst_15 : f32 to vector<16x1xf32>
    %28 = arith.addf %26, %27 : vector<16x1xf32>
    %29 = math.rsqrt %28 : vector<16x1xf32>
    %30 = vector.broadcast %29 : vector<16x1xf32> to vector<16x32xf32>
    %31 = arith.mulf %21, %30 : vector<16x32xf32>
    %c0_16 = arith.constant 0 : index
    %c0_17 = arith.constant 0 : index
    %32 = vector.load %arg6[%c0_16, %c0_17] : memref<1x32xf32, #tpu.memory_space<vmem>>, vector<1x32xf32>
    %33 = vector.broadcast %32 : vector<1x32xf32> to vector<16x32xf32>
    %34 = arith.mulf %31, %33 : vector<16x32xf32>
    %c0_18 = arith.constant 0 : index
    %c0_19 = arith.constant 0 : index
    %35 = vector.load %arg7[%c0_18, %c0_19] : memref<1x32xf32, #tpu.memory_space<vmem>>, vector<1x32xf32>
    %36 = vector.broadcast %35 : vector<1x32xf32> to vector<16x32xf32>
    %37 = arith.addf %34, %36 : vector<16x32xf32>
    %c0_20 = arith.constant 0 : index
    %c0_21 = arith.constant 0 : index
    %38 = vector.load %arg8[%c0_20, %c0_21] : memref<16x32xf32, #tpu.memory_space<vmem>>, vector<16x32xf32>
    tpu.vector_store %arg8[%c0_20, %c0_21], %37 {strides = array<i32>} : memref<16x32xf32, #tpu.memory_space<vmem>>, vector<16x32xf32>,
    return
  }
  func.func @transform_0(%arg0: i32) -> (i32, i32) {
    %c0_i32 = arith.constant 0 : i32
    %c0_i32_0 = arith.constant 0 : i32
    return %arg0, %c0_i32 : i32, i32
  }
  func.func @transform_1(%arg0: i32) -> (i32, i32) {
    %c0_i32 = arith.constant 0 : i32
    %c0_i32_0 = arith.constant 0 : i32
    %c0_i32_1 = arith.constant 0 : i32
    return %c0_i32, %c0_i32_0 : i32, i32
  }
  func.func @transform_2(%arg0: i32) -> (i32, i32) {
    %c0_i32 = arith.constant 0 : i32
    %c0_i32_0 = arith.constant 0 : i32
    %c0_i32_1 = arith.constant 0 : i32
    return %c0_i32, %c0_i32_0 : i32, i32
  }
  func.func @transform_3(%arg0: i32) -> (i32, i32) {
    %c0_i32 = arith.constant 0 : i32
    %c0_i32_0 = arith.constant 0 : i32
    %c0_i32_1 = arith.constant 0 : i32
    return %c0_i32, %c0_i32_0 : i32, i32
  }
  func.func @transform_4(%arg0: i32) -> (i32, i32) {
    %c0_i32 = arith.constant 0 : i32
    %c0_i32_0 = arith.constant 0 : i32
    %c0_i32_1 = arith.constant 0 : i32
    return %c0_i32, %c0_i32_0 : i32, i32
  }
  func.func @transform_5(%arg0: i32) -> (i32, i32) {
    %c0_i32 = arith.constant 0 : i32
    %c0_i32_0 = arith.constant 0 : i32
    %c0_i32_1 = arith.constant 0 : i32
    return %c0_i32, %c0_i32_0 : i32, i32
  }
  func.func @transform_6(%arg0: i32) -> (i32, i32) {
    %c0_i32 = arith.constant 0 : i32
    %c0_i32_0 = arith.constant 0 : i32
    %c0_i32_1 = arith.constant 0 : i32
    return %c0_i32, %c0_i32_0 : i32, i32
  }
  func.func @transform_7(%arg0: i32) -> (i32, i32) {
    %c0_i32 = arith.constant 0 : i32
    %c0_i32_0 = arith.constant 0 : i32
    return %arg0, %c0_i32 : i32, i32
  }
}

</mosaic_0001>

<bundles_post_ra>
// kernel: tpu_custom_call.1
= control target key start
LH: loop header
LB: loop body
LE: loop exit
PB: predicated region body
PF: predicated region fallthrough
CT: control target
= control target key end

     0   :  { %v375_v1 = vmov 0.0   ;;  %vm376_vm0 = vmmov 0   ;;  %vm54_vm1 = vcmask 261120   ;;  %s478_s0 = inlined_call_operand.vmem [shape: f32[16,32], index: 0, kind: input, shape index: {}]   ;;  %s479_s1 = inlined_call_operand.vmem [shape: bf16[32,128], index: 1, kind: input, shape index: {}]   ;;  %s480_s2 = inlined_call_operand.vmem [shape: f32[1,128], index: 2, kind: input, shape index: {}]   ;;  %s481_s3 = inlined_call_operand.vmem [shape: bf16[128,32], index: 3, kind: input, shape index: {}]   ;;  %s482_s4 = inlined_call_operand.vmem [shape: f32[1,32], index: 4, kind: input, shape index: {}]   ;;  %s483_s5 = inlined_call_operand.vmem [shape: f32[1,32], index: 5, kind: input, shape index: {}]   ;;  %s484_s6 = inlined_call_operand.vmem [shape: f32[1,32], index: 6, kind: input, shape index: {}]   ;;  %s485_s7 = inlined_call_operand.hbm [shape: f32[16,32], index: 7, kind: output, shape index: {}]  }
   0x1   :  { %v339_v0 = vld [vmem:[%s479_s1 + $0x8] sm:$0xff]   ;;  %306 = vmatprep.subr.bf16.mxu0 %v375_v1  ;;  %v340_v2 = vld [vmem:[%s479_s1] sm:$0xff]   ;;  %314 = vmatprep.subr.bf16.mxu1 %v375_v1  ;;  %v341_v5 = vld [vmem:[%s481_s3 + $0x38] sm:$0xff]  }
   0x2   :  { %307 = vmatpush3.bf16.msra.mxu0 %v339_v0  ;;  %310 = vmatprep.mubr.msk.bf16.mxu0 %vm376_vm0, %v375_v1  ;;  %v28_v3 = vld [vmem:[%s478_s0] sm:$0xff]  ;;  %v29_v4 = vld [vmem:[%s478_s0 + $0x8] sm:$0xff]  ;;  %v342_v7 = vld [vmem:[%s481_s3 + $0x30] sm:$0xff]  }
   0x3   :  { %308 = vmatprep.subr.bf16.mxu0 %v375_v1  ;;  %330 = vmatprep.mubr.msk.bf16.mxu1 %vm376_vm0, %v375_v1  ;;  %v30_v6 = vpack.c.bf16 %v29_v4, %v28_v3  ;;  %v343_v8 = vld [vmem:[%s481_s3 + $0x28] sm:$0xff]  }
   0x4   :  { %315 = vmatpush3.bf16.msra.mxu1 %v341_v5 }
   0x5   :  { %316 = vmatprep.subr.bf16.mxu1 %v375_v1 }
   0x6   :  { %309 = vmatpush3.bf16.msra.mxu0 %v340_v2 }
   0x8   :  { %317 = vmatpush3.bf16.msra.mxu1 %v342_v7 }
   0x9   :  { %311 = vmatmul.mubr.msk.bf16.vlgmr.msra.gmra.mxu0 %vm54_vm1, %v30_v6  ;;  %318 = vmatprep.subr.bf16.mxu1 %v375_v1 }
   0xa   :  { %12 = vsyncpa [#allocation3], 0  ;;  %v344_v9 = vld [vmem:[%s481_s3 + $0x20] sm:$0xff]   ;;  %v345_v10 = vld [vmem:[%s481_s3 + $0x18] sm:$0xff]   ;;  %s377_s28 = smov [#allocation2]  }
   0xb   :  { %v346_v11 = vld [vmem:[%s481_s3 + $0x10] sm:$0xff]   ;;  %v347_v12 = vld [vmem:[%s481_s3 + $0x8] sm:$0xff]   ;;  %v348_v13 = vld [vmem:[%s481_s3] sm:$0xff]   ;;  %s268_s29 = sshll.u32 %s377_s28, 4  ;;  %s269_s29 = int_to_ptr.vmem [resolvable:$true] %s268_s29 }
   0xc   :  { %319 = vmatpush3.bf16.msra.mxu1 %v343_v8  ;;  %v279_v14 = vld [vmem:[%s480_s2] ss:$0 sm:$0xff]  ;;  %s353_s30 = scalar_lea.vmem %s269_s29, 256  ;;  %p358_p1 = scmp.lt.s32.totalorder %s269_s29, %s269_s29 }
   0xd   :  { %320 = vmatprep.subr.bf16.mxu1 %v375_v1  ;;  %v283_v24 = vld [vmem:[%s482_s4] ss:$0 sm:$0xff]  ;;  %p354_p0 = scmp.ne.s32.totalorder %s269_s29, %s353_s30  ;;  %p359_p2 = scmp.lt.s32.totalorder %s353_s30, %s353_s30 }
   0xe   :  { %v292_v52 = vld [vmem:[%s483_s5] ss:$0 sm:$0xff] }
   0xf   :  { %v293_v54 = vld [vmem:[%s484_s6] ss:$0 sm:$0xff]  ;;  %p360_p3 = por %p359_p2, %p358_p1 }
  0x10   :  { %321 = vmatpush3.bf16.msra.mxu1 %v344_v9 }
  0x11   :  { %322 = vmatprep.subr.bf16.mxu1 %v375_v1  ;;  %p361_p4 = pnand %p360_p3, %p354_p0 }
  0x14   :  { %323 = vmatpush3.bf16.msra.mxu1 %v345_v10 }
  0x15   :  { %324 = vmatprep.subr.bf16.mxu1 %v375_v1 }
  0x18   :  { %325 = vmatpush3.bf16.msra.mxu1 %v346_v11 }
  0x19   :  { %326 = vmatprep.subr.bf16.mxu1 %v375_v1 }
  0x1c   :  { %327 = vmatpush3.bf16.msra.mxu1 %v347_v12 }
  0x1d   :  { %328 = vmatprep.subr.bf16.mxu1 %v375_v1 }
  0x20   :  { %329 = vmatpush3.bf16.msra.mxu1 %v348_v13 }
  0xc9   :  { %v92_v15 = vpop.f32.mrf.mxu0 }
  0xca   :  { %v93_v17 = vadd.f32 %v279_v14, %v92_v15 }
  0xcb   :  { %v312_v16 = vpop.f32.mrf.mxu0 }
  0xcc   :  { %v99_v21 = vmax.f32 %v93_v17, 0.0 }
  0xcd   :  { %v95_v18 = vpop.f32.mrf.mxu0 }
  0xce   :  { %v96_v19 = vadd.f32 %v279_v14, %v95_v18 }
  0xcf   :  { %v313_v20 = vpop.f32.mrf.mxu0 }
  0xd0   :  { %v100_v22 = vmax.f32 %v96_v19, 0.0 }
  0xd2   :  { %v101_v23 = vpack.c.bf16 %v100_v22, %v99_v21 }
  0xd4   :  { %331 = vmatmul.mubr.bf16.vlgmr.msra.gmra.mxu1 %v101_v23 }
 0x194   :  { %v207_v25 = vpop.f32.mrf.mxu1 }
 0x195   :  { %v208_v26 = vadd.f32 %v283_v24, %v207_v25 }
 0x196   :  { %v332_v27 = vpop.f32.mrf.mxu1 }
 0x197   :  { %v214_v28 = vadd.f32 %v208_v26, %v28_v3 }
 0x198   :  { %v210_v29 = vpop.f32.mrf.mxu1 }
 0x199   :  { %v211_v30 = vadd.f32 %v283_v24, %v210_v29  ;;  %v216_v31 = vsel %vm54_vm1, %v214_v28, 0.0 }
 0x19a   :  { %217 = vadd.xlane.f32.xlu0 %v216_v31  ;;  %v333_v32 = vpop.f32.mrf.mxu1 }
 0x19b   :  { %v215_v33 = vadd.f32 %v211_v30, %v29_v4 }
 0x19d   :  { %v219_v34 = vsel %vm54_vm1, %v215_v33, 0.0 }
 0x19e   :  { %220 = vadd.xlane.f32.xlu0 %v219_v34 }
 0x223   :  { %v218_v35 = vpop.xlane.xlu0 %217 }
 0x224   :  { %v223_v36 = vmul.f32 0.03125, %v218_v35 }
 0x226   :  { %v225_v37 = vsub.f32 %v214_v28, %v223_v36 }
 0x227   :  { %v221_v38 = vpop.xlane.xlu0 %220 }
 0x228   :  { %v224_v39 = vmul.f32 0.03125, %v221_v38  ;;  %v227_v40 = vmul.f32 %v225_v37, %v225_v37 }
 0x22a   :  { %v226_v41 = vsub.f32 %v215_v33, %v224_v39  ;;  %v229_v42 = vsel %vm54_vm1, %v227_v40, 0.0 }
 0x22b   :  { %230 = vadd.xlane.f32.xlu1 %v229_v42 }
 0x22c   :  { %v228_v43 = vmul.f32 %v226_v41, %v226_v41 }
 0x22e   :  { %v232_v44 = vsel %vm54_vm1, %v228_v43, 0.0 }
 0x22f   :  { %233 = vadd.xlane.f32.xlu1 %v232_v44 }
 0x2b4   :  { %v231_v45 = vpop.xlane.xlu1 %230 }
 0x2b5   :  { %v235_v46 = vmul.f32 0.03125, %v231_v45 }
 0x2b7   :  { %v237_v47 = vadd.f32 1e-05, %v235_v46 }
 0x2b8   :  { %v234_v48 = vpop.xlane.xlu1 %233 }
 0x2b9   :  { %349 = vrsqrt.f32 %v237_v47  ;;  %v236_v49 = vmul.f32 0.03125, %v234_v48 }
 0x2bb   :  { %v238_v50 = vadd.f32 1e-05, %v236_v49 }
 0x2bd   :  { %351 = vrsqrt.f32 %v238_v50 }
 0x2c6   :  { %v350_v51 = vpop.eup %349 }
 0x2c7   :  { %v241_v53 = vmul.f32 %v350_v51, %v225_v37 }
 0x2c9   :  { %v250_v55 = vmul.f32 %v292_v52, %v241_v53 }
 0x2ca   :  { %v352_v56 = vpop.eup %351 }
 0x2cb   :  { %v242_v57 = vmul.f32 %v352_v56, %v226_v41  ;;  %v259_v58 = vadd.f32 %v293_v54, %v250_v55 }
 0x2cd   :  { %v251_v59 = vmul.f32 %v292_v52, %v242_v57  ;;  %261 = vst.msk [vmem:[#allocation2] sm:$0xff] %vm54_vm1, %v259_v58 }
 0x2cf   :  { %v260_v60 = vadd.f32 %v293_v54, %v251_v59 }
 0x2d1   :  { %262 = vst.msk [vmem:[#allocation2 + $0x8] sm:$0xff] %vm54_vm1, %v260_v60 }
 0x2d2   :  { %364 = shalt.err (!%p361_p4)
}
 0x2d3   :  { %s378_s5 = smov 128   ;;  %s379_s6 = smov 8  }
 0x2d4   :  { %274 = dma.vmem_to_hbm [thread:$0]  %s269_s29, 256, %s485_s7, [#allocation3], %s378_s5, %s378_s5, %s379_s6  }
 0x2d5   :  { %373 = dma.done.wait [#allocation3], 256  }
 0x2d6   :  { %374 = vsyncadd [#allocation3], 4294967040 }
 0x2d7   :  { %278 = vsyncpa [#allocation3], 1 }

// kernel: tpu_custom_call.1
= control target key start
LH: loop header
LB: loop body
LE: loop exit
PB: predicated region body
PF: predicated region fallthrough
CT: control target
= control target key end

     0   :  { %v375_v1 = vmov 0.0   ;;  %vm376_vm0 = vmmov 0   ;;  %vm54_vm1 = vcmask 261120   ;;  %s478_s0 = inlined_call_operand.vmem [shape: f32[16,32], index: 0, kind: input, shape index: {}]   ;;  %s479_s1 = inlined_call_operand.vmem [shape: bf16[32,128], index: 1, kind: input, shape index: {}]   ;;  %s480_s2 = inlined_call_operand.vmem [shape: f32[1,128], index: 2, kind: input, shape index: {}]   ;;  %s481_s3 = inlined_call_operand.vmem [shape: bf16[128,32], index: 3, kind: input, shape index: {}]   ;;  %s482_s4 = inlined_call_operand.vmem [shape: f32[1,32], index: 4, kind: input, shape index: {}]   ;;  %s483_s5 = inlined_call_operand.vmem [shape: f32[1,32], index: 5, kind: input, shape index: {}]   ;;  %s484_s6 = inlined_call_operand.vmem [shape: f32[1,32], index: 6, kind: input, shape index: {}]   ;;  %s485_s7 = inlined_call_operand.hbm [shape: f32[16,32], index: 7, kind: output, shape index: {}]  }
   0x1   :  { %v339_v0 = vld [vmem:[%s479_s1 + $0x8] sm:$0xff]   ;;  %306 = vmatprep.subr.bf16.mxu0 %v375_v1  ;;  %v340_v2 = vld [vmem:[%s479_s1] sm:$0xff]   ;;  %314 = vmatprep.subr.bf16.mxu1 %v375_v1  ;;  %v341_v5 = vld [vmem:[%s481_s3 + $0x38] sm:$0xff]  }
   0x2   :  { %307 = vmatpush3.bf16.msra.mxu0 %v339_v0  ;;  %310 = vmatprep.mubr.msk.bf16.mxu0 %vm376_vm0, %v375_v1  ;;  %v28_v3 = vld [vmem:[%s478_s0] sm:$0xff]  ;;  %v29_v4 = vld [vmem:[%s478_s0 + $0x8] sm:$0xff]  ;;  %v342_v7 = vld [vmem:[%s481_s3 + $0x30] sm:$0xff]  }
   0x3   :  { %308 = vmatprep.subr.bf16.mxu0 %v375_v1  ;;  %330 = vmatprep.mubr.msk.bf16.mxu1 %vm376_vm0, %v375_v1  ;;  %v30_v6 = vpack.c.bf16 %v29_v4, %v28_v3  ;;  %v343_v8 = vld [vmem:[%s481_s3 + $0x28] sm:$0xff]  }
   0x4   :  { %315 = vmatpush3.bf16.msra.mxu1 %v341_v5 }
   0x5   :  { %316 = vmatprep.subr.bf16.mxu1 %v375_v1 }
   0x6   :  { %309 = vmatpush3.bf16.msra.mxu0 %v340_v2 }
   0x8   :  { %317 = vmatpush3.bf16.msra.mxu1 %v342_v7 }
   0x9   :  { %311 = vmatmul.mubr.msk.bf16.vlgmr.msra.gmra.mxu0 %vm54_vm1, %v30_v6  ;;  %318 = vmatprep.subr.bf16.mxu1 %v375_v1 }
   0xa   :  { %12 = vsyncpa [#allocation3], 0  ;;  %v344_v9 = vld [vmem:[%s481_s3 + $0x20] sm:$0xff]   ;;  %v345_v10 = vld [vmem:[%s481_s3 + $0x18] sm:$0xff]   ;;  %s377_s28 = smov [#allocation2]  }
   0xb   :  { %v346_v11 = vld [vmem:[%s481_s3 + $0x10] sm:$0xff]   ;;  %v347_v12 = vld [vmem:[%s481_s3 + $0x8] sm:$0xff]   ;;  %v348_v13 = vld [vmem:[%s481_s3] sm:$0xff]   ;;  %s268_s29 = sshll.u32 %s377_s28, 4  ;;  %s269_s29 = int_to_ptr.vmem [resolvable:$true] %s268_s29 }
   0xc   :  { %319 = vmatpush3.bf16.msra.mxu1 %v343_v8  ;;  %v279_v14 = vld [vmem:[%s480_s2] ss:$0 sm:$0xff]  ;;  %s353_s30 = scalar_lea.vmem %s269_s29, 256  ;;  %p358_p1 = scmp.lt.s32.totalorder %s269_s29, %s269_s29 }
   0xd   :  { %320 = vmatprep.subr.bf16.mxu1 %v375_v1  ;;  %v283_v24 = vld [vmem:[%s482_s4] ss:$0 sm:$0xff]  ;;  %p354_p0 = scmp.ne.s32.totalorder %s269_s29, %s353_s30  ;;  %p359_p2 = scmp.lt.s32.totalorder %s353_s30, %s353_s30 }
   0xe   :  { %v292_v52 = vld [vmem:[%s483_s5] ss:$0 sm:$0xff] }
   0xf   :  { %v293_v54 = vld [vmem:[%s484_s6] ss:$0 sm:$0xff]  ;;  %p360_p3 = por %p359_p2, %p358_p1 }
  0x10   :  { %321 = vmatpush3.bf16.msra.mxu1 %v344_v9 }
  0x11   :  { %322 = vmatprep.subr.bf16.mxu1 %v375_v1  ;;  %p361_p4 = pnand %p360_p3, %p354_p0 }
  0x14   :  { %323 = vmatpush3.bf16.msra.mxu1 %v345_v10 }
  0x15   :  { %324 = vmatprep.subr.bf16.mxu1 %v375_v1 }
  0x18   :  { %325 = vmatpush3.bf16.msra.mxu1 %v346_v11 }
  0x19   :  { %326 = vmatprep.subr.bf16.mxu1 %v375_v1 }
  0x1c   :  { %327 = vmatpush3.bf16.msra.mxu1 %v347_v12 }
  0x1d   :  { %328 = vmatprep.subr.bf16.mxu1 %v375_v1 }
  0x20   :  { %329 = vmatpush3.bf16.msra.mxu1 %v348_v13 }
  0xc9   :  { %v92_v15 = vpop.f32.mrf.mxu0 }
  0xca   :  { %v93_v17 = vadd.f32 %v279_v14, %v92_v15 }
  0xcb   :  { %v312_v16 = vpop.f32.mrf.mxu0 }
  0xcc   :  { %v99_v21 = vmax.f32 %v93_v17, 0.0 }
  0xcd   :  { %v95_v18 = vpop.f32.mrf.mxu0 }
  0xce   :  { %v96_v19 = vadd.f32 %v279_v14, %v95_v18 }
  0xcf   :  { %v313_v20 = vpop.f32.mrf.mxu0 }
  0xd0   :  { %v100_v22 = vmax.f32 %v96_v19, 0.0 }
  0xd2   :  { %v101_v23 = vpack.c.bf16 %v100_v22, %v99_v21 }
  0xd4   :  { %331 = vmatmul.mubr.bf16.vlgmr.msra.gmra.mxu1 %v101_v23 }
 0x194   :  { %v207_v25 = vpop.f32.mrf.mxu1 }
 0x195   :  { %v208_v26 = vadd.f32 %v283_v24, %v207_v25 }
 0x196   :  { %v332_v27 = vpop.f32.mrf.mxu1 }
 0x197   :  { %v214_v28 = vadd.f32 %v208_v26, %v28_v3 }
 0x198   :  { %v210_v29 = vpop.f32.mrf.mxu1 }
 0x199   :  { %v211_v30 = vadd.f32 %v283_v24, %v210_v29  ;;  %v216_v31 = vsel %vm54_vm1, %v214_v28, 0.0 }
 0x19a   :  { %217 = vadd.xlane.f32.xlu0 %v216_v31  ;;  %v333_v32 = vpop.f32.mrf.mxu1 }
 0x19b   :  { %v215_v33 = vadd.f32 %v211_v30, %v29_v4 }
 0x19d   :  { %v219_v34 = vsel %vm54_vm1, %v215_v33, 0.0 }
 0x19e   :  { %220 = vadd.xlane.f32.xlu0 %v219_v34 }
 0x223   :  { %v218_v35 = vpop.xlane.xlu0 %217 }
 0x224   :  { %v223_v36 = vmul.f32 0.03125, %v218_v35 }
 0x226   :  { %v225_v37 = vsub.f32 %v214_v28, %v223_v36 }
 0x227   :  { %v221_v38 = vpop.xlane.xlu0 %220 }
 0x228   :  { %v224_v39 = vmul.f32 0.03125, %v221_v38  ;;  %v227_v40 = vmul.f32 %v225_v37, %v225_v37 }
 0x22a   :  { %v226_v41 = vsub.f32 %v215_v33, %v224_v39  ;;  %v229_v42 = vsel %vm54_vm1, %v227_v40, 0.0 }
 0x22b   :  { %230 = vadd.xlane.f32.xlu1 %v229_v42 }
 0x22c   :  { %v228_v43 = vmul.f32 %v226_v41, %v226_v41 }
 0x22e   :  { %v232_v44 = vsel %vm54_vm1, %v228_v43, 0.0 }
 0x22f   :  { %233 = vadd.xlane.f32.xlu1 %v232_v44 }
 0x2b4   :  { %v231_v45 = vpop.xlane.xlu1 %230 }
 0x2b5   :  { %v235_v46 = vmul.f32 0.03125, %v231_v45 }
 0x2b7   :  { %v237_v47 = vadd.f32 1e-05, %v235_v46 }
 0x2b8   :  { %v234_v48 = vpop.xlane.xlu1 %233 }
 0x2b9   :  { %349 = vrsqrt.f32 %v237_v47  ;;  %v236_v49 = vmul.f32 0.03125, %v234_v48 }
 0x2bb   :  { %v238_v50 = vadd.f32 1e-05, %v236_v49 }
 0x2bd   :  { %351 = vrsqrt.f32 %v238_v50 }
 0x2c6   :  { %v350_v51 = vpop.eup %349 }
 0x2c7   :  { %v241_v53 = vmul.f32 %v350_v51, %v225_v37 }
 0x2c9   :  { %v250_v55 = vmul.f32 %v292_v52, %v241_v53 }
 0x2ca   :  { %v352_v56 = vpop.eup %351 }
 0x2cb   :  { %v242_v57 = vmul.f32 %v352_v56, %v226_v41  ;;  %v259_v58 = vadd.f32 %v293_v54, %v250_v55 }
 0x2cd   :  { %v251_v59 = vmul.f32 %v292_v52, %v242_v57  ;;  %261 = vst.msk [vmem:[#allocation2] sm:$0xff] %vm54_vm1, %v259_v58 }
 0x2cf   :  { %v260_v60 = vadd.f32 %v293_v54, %v251_v59 }
 0x2d1   :  { %262 = vst.msk [vmem:[#allocation2 + $0x8] sm:$0xff] %vm54_vm1, %v260_v60 }
 0x2d2   :  { %364 = shalt.err (!%p361_p4)
}
 0x2d3   :  { %s378_s5 = smov 128   ;;  %s379_s6 = smov 8  }
 0x2d4   :  { %274 = dma.vmem_to_hbm [thread:$0]  %s269_s29, 256, %s485_s7, [#allocation3], %s378_s5, %s378_s5, %s379_s6  }
 0x2d5   :  { %373 = dma.done.wait [#allocation3], 256  }
 0x2d6   :  { %374 = vsyncadd [#allocation3], 4294967040 }
 0x2d7   :  { %278 = vsyncpa [#allocation3], 1 }

</bundles_post_ra>
